<compile_context>
chip_gen: v7x
topology: tpu7x:2x2x1
jax: 0.10.0
libtpu: 0.0.40
codegen_flags: <defaults>
</compile_context>

<pallas_src>
import jax
import jax.numpy as jnp
from jax.experimental import pallas as pl
from jax.experimental.pallas import tpu as pltpu

LANE = 128
SUBLANE = 8
HIDDEN_PAD = 128  # pad hidden=32 up to one full 128-lane row (free: weights are VMEM-resident)


def _round_up(v, m):
    return ((v + m - 1) // m) * m


def simple_net_kernel(x_ref, w1_ref, b1_ref, w2_ref, b2_ref, w3_ref, b3_ref, o_ref):
    # Fused 3-layer MLP on one batch tile: relu(x@W1+b1) -> relu(.@W2+b2) -> .@W3+b3
    x = x_ref[...]
    h1 = jnp.dot(x, w1_ref[...], preferred_element_type=jnp.float32) + b1_ref[...]
    h1 = jnp.maximum(h1, 0.0)
    h2 = jnp.dot(h1, w2_ref[...], preferred_element_type=jnp.float32) + b2_ref[...]
    h2 = jnp.maximum(h2, 0.0)
    out = jnp.dot(h2, w3_ref[...], preferred_element_type=jnp.float32) + b3_ref[...]
    o_ref[...] = out.astype(o_ref.dtype)


def prepare_params(params, hidden_pad=HIDDEN_PAD):
    """One-time hidden-dim padding (32 -> 128). Call once, reuse every forward."""
    w1, b1, w2, b2, w3, b3 = params
    state_dim, hidden = w1.shape
    act_dim = w3.shape[1]
    hp = max(hidden_pad, _round_up(hidden, LANE))

    w1p = jnp.zeros((state_dim, hp), w1.dtype).at[:, :hidden].set(w1)
    b1p = jnp.zeros((1, hp), b1.dtype).at[:, :hidden].set(b1.reshape(1, hidden))
    w2p = jnp.zeros((hp, hp), w2.dtype).at[:hidden, :hidden].set(w2)
    b2p = jnp.zeros((1, hp), b2.dtype).at[:, :hidden].set(b2.reshape(1, hidden))
    w3p = jnp.zeros((hp, act_dim), w3.dtype).at[:hidden, :].set(w3)
    b3p = b3.reshape(1, act_dim)
    return (w1p, b1p, w2p, b2p, w3p, b3p)


def _pick_tile(batch, block_m):
    """Batch tile: multiple of 8 sublanes, <= block_m, >=2 grid steps when possible."""
    if batch <= SUBLANE:
        return batch                       # full-extent block is always legal
    tm = min(int(block_m), _round_up(batch, SUBLANE))
    if pl.cdiv(batch, tm) < 2:             # give v7x's second TensorCore a step
        tm = _round_up(pl.cdiv(batch, 2), SUBLANE)
    return max(SUBLANE, tm)


def _vmem_limit_bytes(tm, state_dim, hp, act_dim):
    f32 = 4

    def tile_bytes(rows, cols):            # VMEM (8,128)-tiled footprint
        return _round_up(rows, SUBLANE) * _round_up(cols, LANE) * f32

    est = (
        2 * tile_bytes(tm, state_dim)      # double-buffered x tile
        + 2 * tile_bytes(tm, act_dim)      # double-buffered out tile
        + 2 * (tile_bytes(state_dim, hp) + tile_bytes(1, hp)
               + tile_bytes(hp, hp) + tile_bytes(1, hp)
               + tile_bytes(hp, act_dim) + tile_bytes(1, act_dim))
    )
    # generous headroom, never below the 32 MiB default, capped below v7x's 64 MiB physical
    return min(max(2 * est + (8 << 20), 32 << 20), 56 << 20)


def simple_net(x, prepared_params, *, block_m=2048):
    """x: [B, state_dim] f32; prepared_params from prepare_params()."""
    w1, b1, w2, b2, w3, b3 = prepared_params
    B, state_dim = x.shape
    hp = w1.shape[1]
    act_dim = w3.shape[1]

    tm = _pick_tile(B, block_m)
    grid = (pl.cdiv(B, tm),)

    flops = 2 * B * (state_dim * hp + hp * hp + hp * act_dim)
    bytes_accessed = 4 * (
        x.size + B * act_dim
        + w1.size + b1.size + w2.size + b2.size + w3.size + b3.size
    )

    const2d = lambda shape: pl.BlockSpec(shape, lambda i: (0, 0))

    out = pl.pallas_call(
        simple_net_kernel,
        out_shape=jax.ShapeDtypeStruct((B, act_dim), jnp.float32),
        grid=grid,
        in_specs=[
            pl.BlockSpec((tm, state_dim), lambda i: (i, 0)),   # x: tiled over batch
            const2d(w1.shape), const2d(b1.shape),              # weights: VMEM-resident
            const2d(w2.shape), const2d(b2.shape),
            const2d(w3.shape), const2d(b3.shape),
        ],
        out_specs=pl.BlockSpec((tm, act_dim), lambda i: (i, 0)),
        compiler_params=pltpu.CompilerParams(
            dimension_semantics=("parallel",),
            vmem_limit_bytes=_vmem_limit_bytes(tm, state_dim, hp, act_dim),
        ),
        cost_estimate=pl.CostEstimate(
            flops=flops, transcendentals=0, bytes_accessed=bytes_accessed
        ),
    )(x, w1, b1, w2, b2, w3, b3)

    return out


def init_params(key, state_dim, act_dim, hidden=32):
    # Deterministic synthetic init (PyTorch-style uniform fan_in bounds).
    ks = jax.random.split(key, 6)

    def linear(kw, kb, fan_in, fan_out):
        bound = 1.0 / jnp.sqrt(fan_in)
        w = jax.random.uniform(kw, (fan_in, fan_out), jnp.float32, -bound, bound)
        b = jax.random.uniform(kb, (1, fan_out), jnp.float32, -bound, bound)
        return w, b

    w1, b1 = linear(ks[0], ks[1], state_dim, hidden)
    w2, b2 = linear(ks[2], ks[3], hidden, hidden)
    w3, b3 = linear(ks[4], ks[5], hidden, act_dim)
    return (w1, b1, w2, b2, w3, b3)


def simple_net_ref(x, params):
    w1, b1, w2, b2, w3, b3 = params
    h1 = jnp.maximum(x @ w1 + b1, 0.0)
    h2 = jnp.maximum(h1 @ w2 + b2, 0.0)
    return h2 @ w3 + b3


if __name__ == "__main__":
    key = jax.random.PRNGKey(0)
    k_x, k_p = jax.random.split(key)

    batch, state_dim, act_dim = 8, 16, 4
    x = jax.random.normal(k_x, (batch, state_dim), jnp.float32)
    params = init_params(k_p, state_dim, act_dim)
    padded_params = prepare_params(params)   # one-time hidden padding, reused per call

    out = simple_net(x, padded_params)
    out = jax.block_until_ready(out)

    ref = simple_net_ref(x, params)
    assert out.shape == (batch, act_dim)
    assert jnp.allclose(out, ref, atol=1e-5, rtol=1e-5)

    print("KERNEL_OK")
</pallas_src>

<mosaic_0001>
module attributes {stable_mosaic.version = 11 : i64} {
  func.func @simple_net_kernel(%arg0: i32, %arg1: memref<8x16xf32, #tpu.memory_space<vmem>>, %arg2: memref<16x128xf32, #tpu.memory_space<vmem>>, %arg3: memref<1x128xf32, #tpu.memory_space<vmem>>, %arg4: memref<128x128xf32, #tpu.memory_space<vmem>>, %arg5: memref<1x128xf32, #tpu.memory_space<vmem>>, %arg6: memref<128x4xf32, #tpu.memory_space<vmem>>, %arg7: memref<1x4xf32, #tpu.memory_space<vmem>>, %arg8: memref<8x4xf32, #tpu.memory_space<vmem>>) attributes {dimension_semantics = [#tpu.dimension_semantics<parallel>], iteration_bounds = array<i64: 1>, scalar_prefetch = 0 : i64, scratch_operands = 0 : i64, tpu.core_type = #tpu.core_type<tc>, window_params = [{transform_indices = @transform_0, window_bounds = array<i64: 8, 16>}, {pipeline_mode = #tpu.pipeline_mode<synchronous>, transform_indices = @transform_1, window_bounds = array<i64: 16, 128>}, {pipeline_mode = #tpu.pipeline_mode<synchronous>, transform_indices = @transform_2, window_bounds = array<i64: 1, 128>}, {pipeline_mode = #tpu.pipeline_mode<synchronous>, transform_indices = @transform_3, window_bounds = array<i64: 128, 128>}, {pipeline_mode = #tpu.pipeline_mode<synchronous>, transform_indices = @transform_4, window_bounds = array<i64: 1, 128>}, {pipeline_mode = #tpu.pipeline_mode<synchronous>, transform_indices = @transform_5, window_bounds = array<i64: 128, 4>}, {pipeline_mode = #tpu.pipeline_mode<synchronous>, transform_indices = @transform_6, window_bounds = array<i64: 1, 4>}, {transform_indices = @transform_7, window_bounds = array<i64: 8, 4>}]} {
    %c0 = arith.constant 0 : index
    %c0_0 = arith.constant 0 : index
    %0 = vector.load %arg1[%c0, %c0_0] : memref<8x16xf32, #tpu.memory_space<vmem>>, vector<8x16xf32>
    %c0_1 = arith.constant 0 : index
    %c0_2 = arith.constant 0 : index
    %1 = vector.load %arg2[%c0_1, %c0_2] : memref<16x128xf32, #tpu.memory_space<vmem>>, vector<16x128xf32>
    %cst = arith.constant dense<0.000000e+00> : vector<8x128xf32>
    %2 = tpu.matmul %0, %1, %cst {dimension_numbers = #tpu.dot_dimension_numbers<[1], [0], [0], [1], [0, 0, 1, 1], [], []>} : vector<8x16xf32>, vector<16x128xf32>, vector<8x128xf32> -> vector<8x128xf32>
    %c0_3 = arith.constant 0 : index
    %c0_4 = arith.constant 0 : index
    %3 = vector.load %arg3[%c0_3, %c0_4] : memref<1x128xf32, #tpu.memory_space<vmem>>, vector<1x128xf32>
    %4 = vector.broadcast %3 : vector<1x128xf32> to vector<8x128xf32>
    %5 = arith.addf %2, %4 : vector<8x128xf32>
    %cst_5 = arith.constant 0.000000e+00 : f32
    %6 = vector.broadcast %cst_5 : f32 to vector<8x128xf32>
    %7 = arith.maximumf %5, %6 : vector<8x128xf32>
    %c0_6 = arith.constant 0 : index
    %c0_7 = arith.constant 0 : index
    %8 = vector.load %arg4[%c0_6, %c0_7] : memref<128x128xf32, #tpu.memory_space<vmem>>, vector<128x128xf32>
    %cst_8 = arith.constant dense<0.000000e+00> : vector<8x128xf32>
    %9 = tpu.matmul %7, %8, %cst_8 {dimension_numbers = #tpu.dot_dimension_numbers<[1], [0], [0], [1], [0, 0, 1, 1], [], []>} : vector<8x128xf32>, vector<128x128xf32>, vector<8x128xf32> -> vector<8x128xf32>
    %c0_9 = arith.constant 0 : index
    %c0_10 = arith.constant 0 : index
    %10 = vector.load %arg5[%c0_9, %c0_10] : memref<1x128xf32, #tpu.memory_space<vmem>>, vector<1x128xf32>
    %11 = vector.broadcast %10 : vector<1x128xf32> to vector<8x128xf32>
    %12 = arith.addf %9, %11 : vector<8x128xf32>
    %cst_11 = arith.constant 0.000000e+00 : f32
    %13 = vector.broadcast %cst_11 : f32 to vector<8x128xf32>
    %14 = arith.maximumf %12, %13 : vector<8x128xf32>
    %c0_12 = arith.constant 0 : index
    %c0_13 = arith.constant 0 : index
    %15 = vector.load %arg6[%c0_12, %c0_13] : memref<128x4xf32, #tpu.memory_space<vmem>>, vector<128x4xf32>
    %cst_14 = arith.constant dense<0.000000e+00> : vector<8x4xf32>
    %16 = tpu.matmul %14, %15, %cst_14 {dimension_numbers = #tpu.dot_dimension_numbers<[1], [0], [0], [1], [0, 0, 1, 1], [], []>} : vector<8x128xf32>, vector<128x4xf32>, vector<8x4xf32> -> vector<8x4xf32>
    %c0_15 = arith.constant 0 : index
    %c0_16 = arith.constant 0 : index
    %17 = vector.load %arg7[%c0_15, %c0_16] : memref<1x4xf32, #tpu.memory_space<vmem>>, vector<1x4xf32>
    %18 = vector.broadcast %17 : vector<1x4xf32> to vector<8x4xf32>
    %19 = arith.addf %16, %18 : vector<8x4xf32>
    %c0_17 = arith.constant 0 : index
    %c0_18 = arith.constant 0 : index
    %20 = vector.load %arg8[%c0_17, %c0_18] : memref<8x4xf32, #tpu.memory_space<vmem>>, vector<8x4xf32>
    tpu.vector_store %arg8[%c0_17, %c0_18], %19 {strides = array<i32>} : memref<8x4xf32, #tpu.memory_space<vmem>>, vector<8x4xf32>,
    return
  }
  func.func @transform_0(%arg0: i32) -> (i32, i32) {
    %c0_i32 = arith.constant 0 : i32
    %c0_i32_0 = arith.constant 0 : i32
    return %arg0, %c0_i32 : i32, i32
  }
  func.func @transform_1(%arg0: i32) -> (i32, i32) {
    %c0_i32 = arith.constant 0 : i32
    %c0_i32_0 = arith.constant 0 : i32
    %c0_i32_1 = arith.constant 0 : i32
    return %c0_i32, %c0_i32_0 : i32, i32
  }
  func.func @transform_2(%arg0: i32) -> (i32, i32) {
    %c0_i32 = arith.constant 0 : i32
    %c0_i32_0 = arith.constant 0 : i32
    %c0_i32_1 = arith.constant 0 : i32
    return %c0_i32, %c0_i32_0 : i32, i32
  }
  func.func @transform_3(%arg0: i32) -> (i32, i32) {
    %c0_i32 = arith.constant 0 : i32
    %c0_i32_0 = arith.constant 0 : i32
    %c0_i32_1 = arith.constant 0 : i32
    return %c0_i32, %c0_i32_0 : i32, i32
  }
  func.func @transform_4(%arg0: i32) -> (i32, i32) {
    %c0_i32 = arith.constant 0 : i32
    %c0_i32_0 = arith.constant 0 : i32
    %c0_i32_1 = arith.constant 0 : i32
    return %c0_i32, %c0_i32_0 : i32, i32
  }
  func.func @transform_5(%arg0: i32) -> (i32, i32) {
    %c0_i32 = arith.constant 0 : i32
    %c0_i32_0 = arith.constant 0 : i32
    %c0_i32_1 = arith.constant 0 : i32
    return %c0_i32, %c0_i32_0 : i32, i32
  }
  func.func @transform_6(%arg0: i32) -> (i32, i32) {
    %c0_i32 = arith.constant 0 : i32
    %c0_i32_0 = arith.constant 0 : i32
    %c0_i32_1 = arith.constant 0 : i32
    return %c0_i32, %c0_i32_0 : i32, i32
  }
  func.func @transform_7(%arg0: i32) -> (i32, i32) {
    %c0_i32 = arith.constant 0 : i32
    %c0_i32_0 = arith.constant 0 : i32
    return %arg0, %c0_i32 : i32, i32
  }
}

</mosaic_0001>

<bundles_post_ra>
// kernel: tpu_custom_call.1
= control target key start
LH: loop header
LB: loop body
LE: loop exit
PB: predicated region body
PF: predicated region fallthrough
CT: control target
= control target key end

     0   :  { %12 = vsyncpa [#allocation3], 0  ;;  %s518_s24 = smov [#allocation2]   ;;  %s707_s0 = inlined_call_operand.vmem [shape: f32[8,16], index: 0, kind: input, shape index: {}]   ;;  %s708_s1 = inlined_call_operand.hbm [shape: f32[16,128], index: 1, kind: input, shape index: {}]   ;;  %s709_s2 = inlined_call_operand.vmem [shape: f32[1,128], index: 2, kind: input, shape index: {}]   ;;  %s710_s3 = inlined_call_operand.vmem [shape: f32[128,128], index: 3, kind: input, shape index: {}]   ;;  %s711_s4 = inlined_call_operand.vmem [shape: f32[1,128], index: 4, kind: input, shape index: {}]   ;;  %s712_s5 = inlined_call_operand.vmem [shape: f32[128,4], index: 5, kind: input, shape index: {}]   ;;  %s713_s6 = inlined_call_operand.vmem [shape: f32[1,4], index: 6, kind: input, shape index: {}]   ;;  %s714_s7 = inlined_call_operand.vmem [shape: f32[8,4], index: 7, kind: output, shape index: {}]  }
   0x1   :  { %s20_s25 = sshll.u32 %s518_s24, 4  ;;  %s494_s28 = scalar_lea.hbm %s708_s1, 256  ;;  %s21_s25 = int_to_ptr.vmem [resolvable:$true] %s20_s25 }
   0x2   :  { %p495_p0 = scmp.ne.s32.totalorder %s708_s1, %s494_s28  ;;  %p498_p1 = scmp.lt.u32.totalorder %s494_s28, %s708_s1 }
   0x4   :  { %p500_p2 = pnand %p498_p1, %p495_p0 }
   0x6   :  { %503 = shalt.err (!%p500_p2)
}
   0x7   :  { %s504_s10 = scalar_lea.vmem %s21_s25, 256  ;;  %p509_p4 = scmp.lt.s32.totalorder %s21_s25, %s21_s25 }
   0x8   :  { %p505_p3 = scmp.ne.s32.totalorder %s21_s25, %s504_s10  ;;  %p510_p5 = scmp.lt.s32.totalorder %s504_s10, %s504_s10 }
   0xa   :  { %p511_p6 = por %p510_p5, %p509_p4 }
   0xc   :  { %p512_p7 = pnand %p511_p6, %p505_p3 }
   0xe   :  { %515 = shalt.err (!%p512_p7)
}
   0xf   :  { %s519_s11 = smov 128   ;;  %s520_s12 = smov 8  }
  0x10   :  { %26 = dma.hbm_to_vmem [thread:$0]  %s708_s1, 256, %s21_s25, [#allocation3], %s519_s11, %s519_s11, %s520_s12  }
  0x11   :  { %516 = dma.done.wait [#allocation3], 256  }
  0x12   :  { %517 = vsyncadd [#allocation3], 4294967040  ;;  %v521_v0 = vmov 0.0|0.0   ;;  %vm522_vm0 = vmmov 0   ;;  %v523_v1 = vmov 0.0   ;;  %v41_v2 = vld [vmem:[#allocation2] sm:$0xff] }
  0x13   :  { %437 = vmatprep.subr.bf16.mxu0 %v521_v0  ;;  %364 = vmatprep.mubr.msk.f32.mxu0 %vm522_vm0, %v523_v1  ;;  %v42_v3 = vld [vmem:[#allocation2 + $0x8] sm:$0xff]  ;;  %v125_v5 = vld [vmem:[%s710_s3] sm:$0xff]  ;;  %v127_v7 = vld [vmem:[%s710_s3 + $0x10] sm:$0xff]  ;;  %vm50_vm1 = vcmask 130048   ;;  %vm312_vm2 = vcmask 31744  }
  0x14   :  { %440 = vmatprep.subr.bf16.mxu1 %v521_v0  ;;  %399 = vmatprep.mubr.msk.f32.mxu1 %vm522_vm0, %v523_v1  ;;  %v438_v4 = vpack.c.bf16 %v42_v3, %v41_v2  ;;  %v126_v6 = vld [vmem:[%s710_s3 + $0x8] sm:$0xff]  ;;  %v128_v9 = vld [vmem:[%s710_s3 + $0x18] sm:$0xff]  ;;  %v40_v10 = vld [vmem:[%s707_s0] sm:$0xff] }
  0x15   :  { %v441_v8 = vpack.c.bf16 %v126_v6, %v125_v5  ;;  %v444_v11 = vpack.c.bf16 %v128_v9, %v127_v7  ;;  %v129_v12 = vld [vmem:[%s710_s3 + $0x20] sm:$0xff]  ;;  %v130_v13 = vld [vmem:[%s710_s3 + $0x28] sm:$0xff]  ;;  %v131_v15 = vld [vmem:[%s710_s3 + $0x30] sm:$0xff] }
  0x16   :  { %439 = vmatpush3.bf16.msra.mxu0 %v438_v4  ;;  %v447_v14 = vpack.c.bf16 %v130_v13, %v129_v12  ;;  %v132_v16 = vld [vmem:[%s710_s3 + $0x38] sm:$0xff]  ;;  %v133_v18 = vld [vmem:[%s710_s3 + $0x40] sm:$0xff]  ;;  %v134_v19 = vld [vmem:[%s710_s3 + $0x48] sm:$0xff] }
  0x17   :  { %442 = vmatpush3.bf16.msra.mxu1 %v441_v8  ;;  %464 = vmatprep.subr.bf16.mxu0 %v521_v0  ;;  %v450_v17 = vpack.c.bf16 %v132_v16, %v131_v15  ;;  %v453_v20 = vpack.c.bf16 %v134_v19, %v133_v18  ;;  %v135_v21 = vld [vmem:[%s710_s3 + $0x50] sm:$0xff]  ;;  %v136_v22 = vld [vmem:[%s710_s3 + $0x58] sm:$0xff]  ;;  %v137_v24 = vld [vmem:[%s710_s3 + $0x60] sm:$0xff] }
  0x18   :  { %443 = vmatprep.subr.bf16.mxu1 %v521_v0  ;;  %v456_v23 = vpack.c.bf16 %v136_v22, %v135_v21  ;;  %v138_v25 = vld [vmem:[%s710_s3 + $0x68] sm:$0xff]  ;;  %v139_v27 = vld [vmem:[%s710_s3 + $0x70] sm:$0xff]  ;;  %v140_v28 = vld [vmem:[%s710_s3 + $0x78] sm:$0xff] }
  0x19   :  { %365 = vmatmul.mubr.msk.f32.vlgmr.msra.gmra.mrb[0].mxu0 %vm50_vm1, %v40_v10  ;;  %v459_v26 = vpack.c.bf16 %v138_v25, %v137_v24  ;;  %v462_v29 = vpack.c.bf16 %v140_v28, %v139_v27  ;;  %v219_v30 = vld [vmem:[%s712_s5] sm:$0xff]  ;;  %v220_v31 = vld [vmem:[%s712_s5 + $0x8] sm:$0xff]  ;;  %v221_v32 = vld [vmem:[%s712_s5 + $0x10] sm:$0xff] }
  0x1a   :  { %434 = vmatprep.mubr.msk.f32.mxu0 %vm522_vm0, %v523_v1  ;;  %v465_v33 = vpack.c.bf16 %v220_v31, %v219_v30  ;;  %v222_v34 = vld [vmem:[%s712_s5 + $0x18] sm:$0xff]  ;;  %v223_v36 = vld [vmem:[%s712_s5 + $0x20] sm:$0xff]  ;;  %v224_v37 = vld [vmem:[%s712_s5 + $0x28] sm:$0xff] }
  0x1b   :  { %445 = vmatpush3.bf16.msra.mxu1 %v444_v11  ;;  %v468_v35 = vpack.c.bf16 %v222_v34, %v221_v32  ;;  %v471_v38 = vpack.c.bf16 %v224_v37, %v223_v36  ;;  %v225_v39 = vld [vmem:[%s712_s5 + $0x30] sm:$0xff]  ;;  %v226_v40 = vld [vmem:[%s712_s5 + $0x38] sm:$0xff]  ;;  %v227_v42 = vld [vmem:[%s712_s5 + $0x40] sm:$0xff] }
  0x1c   :  { %446 = vmatprep.subr.bf16.mxu1 %v521_v0  ;;  %466 = vmatpush3.bf16.msra.mxu0 %v465_v33  ;;  %v474_v41 = vpack.c.bf16 %v226_v40, %v225_v39  ;;  %v228_v43 = vld [vmem:[%s712_s5 + $0x48] sm:$0xff]  ;;  %v229_v45 = vld [vmem:[%s712_s5 + $0x50] sm:$0xff]  ;;  %v230_v46 = vld [vmem:[%s712_s5 + $0x58] sm:$0xff] }
  0x1d   :  { %467 = vmatprep.subr.bf16.mxu0 %v521_v0  ;;  %v477_v44 = vpack.c.bf16 %v228_v43, %v227_v42  ;;  %v480_v47 = vpack.c.bf16 %v230_v46, %v229_v45  ;;  %v231_v48 = vld [vmem:[%s712_s5 + $0x60] sm:$0xff]  ;;  %v232_v49 = vld [vmem:[%s712_s5 + $0x68] sm:$0xff]  ;;  %v233_v56 = vld [vmem:[%s712_s5 + $0x70] sm:$0xff] }
  0x1e   :  { %v483_v50 = vpack.c.bf16 %v232_v49, %v231_v48  ;;  %v319_v51 = vld [vmem:[%s709_s2] ss:$0 sm:$0xff]  ;;  %v234_v57 = vld [vmem:[%s712_s5 + $0x78] sm:$0xff] }
  0x1f   :  { %448 = vmatpush3.bf16.msra.mxu1 %v447_v14  ;;  %v486_v58 = vpack.c.bf16 %v234_v57, %v233_v56  ;;  %v321_v59 = vld [vmem:[%s711_s4] ss:$0 sm:$0xff] }
  0x20   :  { %449 = vmatprep.subr.bf16.mxu1 %v521_v0  ;;  %469 = vmatpush3.bf16.msra.mxu0 %v468_v35 }
  0x21   :  { %470 = vmatprep.subr.bf16.mxu0 %v521_v0 }
  0x23   :  { %451 = vmatpush3.bf16.msra.mxu1 %v450_v17 }
  0x24   :  { %452 = vmatprep.subr.bf16.mxu1 %v521_v0  ;;  %472 = vmatpush3.bf16.msra.mxu0 %v471_v38 }
  0x25   :  { %473 = vmatprep.subr.bf16.mxu0 %v521_v0 }
  0x27   :  { %454 = vmatpush3.bf16.msra.mxu1 %v453_v20 }
  0x28   :  { %455 = vmatprep.subr.bf16.mxu1 %v521_v0  ;;  %475 = vmatpush3.bf16.msra.mxu0 %v474_v41 }
  0x29   :  { %476 = vmatprep.subr.bf16.mxu0 %v521_v0 }
  0x2b   :  { %457 = vmatpush3.bf16.msra.mxu1 %v456_v23 }
  0x2c   :  { %458 = vmatprep.subr.bf16.mxu1 %v521_v0  ;;  %478 = vmatpush3.bf16.msra.mxu0 %v477_v44 }
  0x2d   :  { %479 = vmatprep.subr.bf16.mxu0 %v521_v0 }
  0x2f   :  { %460 = vmatpush3.bf16.msra.mxu1 %v459_v26 }
  0x30   :  { %461 = vmatprep.subr.bf16.mxu1 %v521_v0  ;;  %481 = vmatpush3.bf16.msra.mxu0 %v480_v47 }
  0x31   :  { %482 = vmatprep.subr.bf16.mxu0 %v521_v0 }
  0x33   :  { %463 = vmatpush3.bf16.msra.mxu1 %v462_v29 }
  0x34   :  { %484 = vmatpush3.bf16.msra.mxu0 %v483_v50 }
  0x35   :  { %485 = vmatprep.subr.bf16.mxu0 %v521_v0  ;;  %v322_v0 = vld [vmem:[%s713_s6] ss:$0 sm:$0xff] }
  0x38   :  { %487 = vmatpush3.bf16.msra.mxu0 %v486_v58 }
  0xec   :  { %v120_v52 = vpop.f32.mrb[0].mxu0 }
  0xed   :  { %v121_v53 = vadd.f32 %v319_v51, %v120_v52  ;;  %v366_v54 = vpop.f32.mrb[1].mxu0 }
  0xef   :  { %v124_v55 = vmax.f32 %v121_v53, 0.0 }
  0xf1   :  { %400 = vmatmul.mubr.f32.vlgmr.msra.gmra.mrb[0].mxu1 %v124_v55 }
 0x1c4   :  { %v214_v60 = vpop.f32.mrb[0].mxu1 }
 0x1c5   :  { %v215_v61 = vadd.f32 %v321_v59, %v214_v60  ;;  %v401_v62 = vpop.f32.mrb[1].mxu1 }
 0x1c7   :  { %v218_v63 = vmax.f32 %v215_v61, 0.0 }
 0x1c9   :  { %435 = vmatmul.mubr.f32.vlgmr.msra.gmra.mrb[2].mxu0 %v218_v63 }
 0x29c   :  { %v308_v1 = vpop.f32.mrb[2].mxu0 }
 0x29d   :  { %v309_v2 = vadd.f32 %v322_v0, %v308_v1  ;;  %v436_v3 = vpop.f32.mrb[3].mxu0 }
 0x29f   :  { %313 = vst.msk [vmem:[%s714_s7] sm:$0xff] %vm312_vm2, %v309_v2 }
 0x2a0   :  { %318 = vsyncpa [#allocation3], 1 }

</bundles_post_ra>
